<compile_context>
chip_gen: v7x
topology: tpu7x:2x2x1
jax: 0.10.0
libtpu: 0.0.40
codegen_flags: <defaults>
</compile_context>

<pallas_src>
import functools

import jax
import jax.numpy as jnp
from jax import lax
from jax.experimental import pallas as pl
from jax.experimental.pallas import tpu as pltpu


# ----------------------------------------------------------------------------
# Helpers / per-generation config
# ----------------------------------------------------------------------------
def _round_up(x, m):
    return (x + m - 1) // m * m


def _cdiv(a, b):
    return -(-a // b)


def _chip_config():
    """Per-generation tuning (VMEM sizing, bf16-VPU availability)."""
    kind = ""
    try:
        kind = jax.devices()[0].device_kind.lower()
    except Exception:
        pass
    big_vmem = ("v5" in kind) or ("v6" in kind)          # 128 MiB VMEM parts
    bf16_vpu = ("v6" in kind) or ("v7" in kind) or ("7x" in kind)
    return {
        "vmem_limit": (100 if big_vmem else 48) * 1024 * 1024,
        "tile_budget": (32 if big_vmem else 16) * 1024 * 1024,
        "row_cap": 2048 if big_vmem else 1024,
        # v5e has no bf16 VPU/EUP -> keep the elementwise LeakyReLU in f32 there.
        "bf16_eltwise": bool(bf16_vpu),
    }


def _row_tile(p, per_row, fixed, cfg, min_steps=2):
    """Largest row tile (mult of 8) fitting the per-step budget, with >= min_steps steps."""
    budget = max(cfg["tile_budget"] - fixed, 8 * per_row)
    t = budget // max(per_row, 1)
    t = max(8, min(int(t), cfg["row_cap"]))
    t = (t // 8) * 8
    t = min(t, max(8, _round_up(_cdiv(p, min_steps), 8)))
    return max(8, t)


def _pad_rows(a, p_pad):
    p = a.shape[0]
    if p == p_pad:
        return a
    return jnp.pad(a, [(0, p_pad - p)] + [(0, 0)] * (a.ndim - 1))


def _pad_cols(a, c_pad):
    c = a.shape[-1]
    if c == c_pad:
        return a
    return jnp.pad(a, [(0, 0)] * (a.ndim - 1) + [(0, c_pad - c)])


def _params(grid, cfg):
    return pltpu.CompilerParams(dimension_semantics=("parallel",) * len(grid),
                                vmem_limit_bytes=cfg["vmem_limit"])


def _fori(lo, hi, body, init, unroll):
    try:
        return lax.fori_loop(lo, hi, body, init, unroll=unroll)
    except TypeError:                      # very old jax without `unroll`
        return lax.fori_loop(lo, hi, body, init)


# ----------------------------------------------------------------------------
# Pallas kernels
# ----------------------------------------------------------------------------
def _uv_kernel(x_ref, w_ref, t_ref, u_ref, v_ref, *, hp):
    """Per-point half of edge-MLP layer 1 as ONE fused matmul (BN scale folded into W):
       [u | v] = x @ [W1_top' | (W1_bot'-W1_top')] + [0 | shift1]."""
    y = jnp.dot(x_ref[...], w_ref[...], preferred_element_type=jnp.float32) + t_ref[...]
    u_ref[...] = y[:, :hp].astype(u_ref.dtype)
    v_ref[...] = y[:, hp:].astype(v_ref.dtype)


def _edge_kernel(idx_ref, u_ref, v_ref, w2_ref, t2_ref, o_ref, g_ref, *,
                 k, tn, bf16_eltwise):
    """Edge MLP tail with fused neighbor gather, streaming over k.

    idx_ref : SMEM (B, N_pad*k) int32   (scalar-prefetched kNN table)
    u_ref   : VMEM (N_pad, Hp) f32      (whole batch resident; gather source)
    v_ref   : VMEM (tn, Hp) f32         (center-point term, includes shift1)
    out     : max_k LeakyReLU( LeakyReLU(u_j + v_i) @ W2' + t2 )   (t2/LReLU after max)
    """
    b = pl.program_id(0)
    it = pl.program_id(1)
    row0 = it * tn
    v = v_ref[...]
    w2 = w2_ref[...]
    acc = None
    for kk in range(k):                           # static, small loop over neighbors
        def gather_row(r, carry):
            j = idx_ref[b, (row0 + r) * k + kk]
            g_ref[pl.ds(r, 1), :] = u_ref[pl.ds(j, 1), :]
            return carry
        _fori(0, tn, gather_row, 0, unroll=8)
        h = g_ref[...] + v                        # f32 add (exact for identical neighbors)
        if bf16_eltwise:                          # v6e / v7x: bf16 VPU available
            h = h.astype(jnp.bfloat16)
            h = jnp.where(h > 0, h, h * 0.2)
        else:                                     # v5e: keep elementwise math in f32
            h = jnp.where(h > 0, h, h * 0.2)
            h = h.astype(jnp.bfloat16)
        y = jnp.dot(h, w2, preferred_element_type=jnp.float32)
        acc = y if acc is None else jnp.maximum(acc, y)
    acc = acc + t2_ref[...]                       # shift + activation AFTER the max
    o_ref[...] = jnp.where(acc > 0, acc, acc * 0.2).astype(o_ref.dtype)


def _head_kernel(x1_ref, x2_ref, x3_ref, w1a_ref, w1b_ref, w1c_ref, t1_ref,
                 w2_ref, t2_ref, w3_ref, b3_ref, o_ref):
    """Head: (x1|x2|x3) @ W1 split row-wise (no HBM concat) + BN + ReLU,
       then matmul+BN+ReLU, then matmul + bias (is_out layer)."""
    h = jnp.dot(x1_ref[...], w1a_ref[...], preferred_element_type=jnp.float32)
    h += jnp.dot(x2_ref[...], w1b_ref[...], preferred_element_type=jnp.float32)
    h += jnp.dot(x3_ref[...], w1c_ref[...], preferred_element_type=jnp.float32)
    h = jnp.maximum(h + t1_ref[...], 0.0)
    h = jnp.dot(h.astype(jnp.bfloat16), w2_ref[...], preferred_element_type=jnp.float32)
    h = jnp.maximum(h + t2_ref[...], 0.0)
    o_ref[...] = jnp.dot(h.astype(jnp.bfloat16), w3_ref[...],
                         preferred_element_type=jnp.float32) + b3_ref[...]


# ----------------------------------------------------------------------------
# Pallas wrappers
# ----------------------------------------------------------------------------
def uv_pallas(x, w_uv, t_uv, hp, cfg):
    """x: (P, Cin) bf16 -> u, v: (P, Hp) f32 (per-point layer-1 pieces)."""
    p, cinp = x.shape
    two_hp = w_uv.shape[1]
    per_row = 4 * cinp + 24 * hp                   # x(2buf bf16) + u,v(2buf f32) + y f32
    fixed = 4 * cinp * two_hp
    tn = _row_tile(p, per_row, fixed, cfg)
    p_pad = _round_up(p, tn)
    grid = (p_pad // tn,)
    u, v = pl.pallas_call(
        functools.partial(_uv_kernel, hp=hp),
        out_shape=(jax.ShapeDtypeStruct((p_pad, hp), jnp.float32),
                   jax.ShapeDtypeStruct((p_pad, hp), jnp.float32)),
        grid_spec=pltpu.PrefetchScalarGridSpec(
            num_scalar_prefetch=0,
            grid=grid,
            in_specs=[
                pl.BlockSpec((tn, cinp), lambda i: (i, 0)),
                pl.BlockSpec((cinp, two_hp), lambda i: (0, 0)),
                pl.BlockSpec((1, two_hp), lambda i: (0, 0)),
            ],
            out_specs=[pl.BlockSpec((tn, hp), lambda i: (i, 0)),
                       pl.BlockSpec((tn, hp), lambda i: (i, 0))],
        ),
        compiler_params=_params(grid, cfg),
    )(_pad_rows(x, p_pad), w_uv, t_uv)
    if p_pad != p:
        u, v = u[:p], v[:p]
    return u, v


def edge_pallas(u, v, idx_flat, w2, t2, k, tn, cfg):
    """u, v: (B, N_pad, Hp) f32; idx_flat: (B, N_pad*k) int32 -> (B, N_pad, coutp) bf16."""
    B, n_pad, hp = u.shape
    coutp = w2.shape[1]
    assert n_pad % tn == 0
    grid = (B, n_pad // tn)
    kern = functools.partial(_edge_kernel, k=k, tn=tn,
                             bf16_eltwise=cfg["bf16_eltwise"])
    out = pl.pallas_call(
        kern,
        out_shape=jax.ShapeDtypeStruct((B, n_pad, coutp), jnp.bfloat16),
        grid_spec=pltpu.PrefetchScalarGridSpec(
            num_scalar_prefetch=1,
            grid=grid,
            in_specs=[
                pl.BlockSpec((None, n_pad, hp), lambda b, i, idx: (b, 0, 0)),  # u resident
                pl.BlockSpec((None, tn, hp), lambda b, i, idx: (b, i, 0)),     # v tile
                pl.BlockSpec((hp, coutp), lambda b, i, idx: (0, 0)),
                pl.BlockSpec((1, coutp), lambda b, i, idx: (0, 0)),
            ],
            out_specs=pl.BlockSpec((None, tn, coutp), lambda b, i, idx: (b, i, 0)),
            scratch_shapes=[pltpu.VMEM((tn, hp), jnp.float32)],                # gather tile
        ),
        compiler_params=_params(grid, cfg),
    )(idx_flat, u, v, w2, t2)
    return out


def head_pallas(x1, x2, x3, w1a, w1b, w1c, t1, w2, t2, w3, b3, cfg):
    """x1/x2/x3: (P, Ci_pad) bf16 -> (P, Cout_pad) f32."""
    p = x1.shape[0]
    c1, c2, c3 = x1.shape[1], x2.shape[1], x3.shape[1]
    h1, h2, coutp = w1a.shape[1], w2.shape[1], w3.shape[1]
    per_row = 4 * (c1 + c2 + c3) + 6 * (h1 + h2) + 12 * coutp
    fixed = 4 * ((c1 + c2 + c3) * h1 + h1 * h2 + h2 * coutp)
    tn = _row_tile(p, per_row, fixed, cfg)
    p_pad = _round_up(p, tn)
    grid = (p_pad // tn,)
    out = pl.pallas_call(
        _head_kernel,
        out_shape=jax.ShapeDtypeStruct((p_pad, coutp), jnp.float32),
        grid_spec=pltpu.PrefetchScalarGridSpec(
            num_scalar_prefetch=0,
            grid=grid,
            in_specs=[
                pl.BlockSpec((tn, c1), lambda i: (i, 0)),
                pl.BlockSpec((tn, c2), lambda i: (i, 0)),
                pl.BlockSpec((tn, c3), lambda i: (i, 0)),
                pl.BlockSpec((c1, h1), lambda i: (0, 0)),
                pl.BlockSpec((c2, h1), lambda i: (0, 0)),
                pl.BlockSpec((c3, h1), lambda i: (0, 0)),
                pl.BlockSpec((1, h1), lambda i: (0, 0)),
                pl.BlockSpec((h1, h2), lambda i: (0, 0)),
                pl.BlockSpec((1, h2), lambda i: (0, 0)),
                pl.BlockSpec((h2, coutp), lambda i: (0, 0)),
                pl.BlockSpec((1, coutp), lambda i: (0, 0)),
            ],
            out_specs=pl.BlockSpec((tn, coutp), lambda i: (i, 0)),
        ),
        compiler_params=_params(grid, cfg),
    )(_pad_rows(x1, p_pad), _pad_rows(x2, p_pad), _pad_rows(x3, p_pad),
      w1a, w1b, w1c, t1, w2, t2, w3, b3)
    return out if p_pad == p else out[:p]


# ----------------------------------------------------------------------------
# Plain-JAX glue: kNN index selection (same graph for all three blocks)
# ----------------------------------------------------------------------------
def knn_idx(pos, k):
    """pos: (B, N, D) -> (B, N, k) indices of the k nearest points (self included)."""
    sq = jnp.sum(pos * pos, axis=-1)
    inner = jnp.einsum("bnd,bmd->bnm", pos, pos)
    neg_dist = 2.0 * inner - sq[:, :, None] - sq[:, None, :]
    _, idx = jax.lax.top_k(neg_dist, k)
    return idx.astype(jnp.int32)


# ----------------------------------------------------------------------------
# Full forward (Pallas path)
# ----------------------------------------------------------------------------
def _edge_tile(n8, hp, coutp, B, cfg):
    fixed = 8 * n8 * hp + 4 * hp * coutp           # resident u (2 buf f32) + W2 (2 buf bf16)
    per_row = 18 * hp + 12 * coutp                 # v/g/h + y/acc/out streams
    min_steps = 1 if B >= 2 else 2
    return min(_row_tile(n8, per_row, fixed, cfg, min_steps=min_steps), n8)


def dgcnn_forward_pallas(pp, x, pos, k):
    cfg = pp["cfg"]
    B, N, _ = x.shape
    idx = knn_idx(pos, k)                          # (B, N, k), kNN on `pos`

    names = ("conv1", "conv2", "conv3")
    hp_max = max(pp[n]["hp"] for n in names)
    coutp_max = max(pp[n]["w2"].shape[1] for n in names)
    n8 = _round_up(N, 8)
    tn_e = _edge_tile(n8, hp_max, coutp_max, B, cfg)
    n_pad = _round_up(n8, tn_e)

    if n_pad != N:
        x = jnp.pad(x, ((0, 0), (0, n_pad - N), (0, 0)))
        idx = jnp.pad(idx, ((0, 0), (0, n_pad - N), (0, 0)))   # pad rows index point 0
    idx_flat = idx.reshape(B, n_pad * k)

    feat = x.reshape(B * n_pad, -1).astype(jnp.bfloat16)
    feats = []
    for name in names:
        blk = pp[name]
        hp = blk["hp"]
        u, v = uv_pallas(feat, blk["w_uv"], blk["t_uv"], hp, cfg)
        out = edge_pallas(u.reshape(B, n_pad, hp), v.reshape(B, n_pad, hp),
                          idx_flat, blk["w2"], blk["t2"], k, tn_e, cfg)
        feat = out.reshape(B * n_pad, -1)
        feats.append(feat)

    hd = pp["head"]
    out = head_pallas(feats[0], feats[1], feats[2],
                      hd["w1a"], hd["w1b"], hd["w1c"], hd["t1"],
                      hd["w2"], hd["t2"], hd["w3"], hd["b3"], cfg)
    out = out.reshape(B, n_pad, -1)
    return out[:, :N, :pp["out_channels"]]


# ----------------------------------------------------------------------------
# Pure-JAX f32 reference (module semantics, for correctness check)
# ----------------------------------------------------------------------------
def get_edge_features(x, idx):
    xj = jax.vmap(lambda xb, ib: xb[ib])(x, idx)
    xi = jnp.broadcast_to(x[:, :, None, :], xj.shape)
    return jnp.concatenate([xj - xi, xi], axis=-1)


def _edge_conv_ref(e, w1, s1, t1, w2, s2, t2):
    h = jnp.einsum("pkc,ch->pkh", e, w1) * s1 + t1
    h = jnp.where(h > 0, h, 0.2 * h)
    y = jnp.einsum("pkh,ho->pko", h, w2) * s2 + t2
    y = jnp.where(y > 0, y, 0.2 * y)
    return jnp.max(y, axis=1)


def _final_mlp_ref(x, w1, s1, t1, w2, s2, t2, w3, b3):
    h = jnp.maximum(x @ w1 * s1 + t1, 0.0)
    h = jnp.maximum(h @ w2 * s2 + t2, 0.0)
    return h @ w3 + b3


def dgcnn_forward_ref(params, x, pos, k):
    B, N, _ = x.shape
    idx = knn_idx(pos, k)

    def block(feat, p):
        e = get_edge_features(feat, idx).reshape(B * N, idx.shape[-1], -1)
        return _edge_conv_ref(e, *p).reshape(B, N, -1)

    x1 = block(x, params["conv1"])
    x2 = block(x1, params["conv2"])
    x3 = block(x2, params["conv3"])
    cat = jnp.concatenate([x1, x2, x3], axis=-1).reshape(B * N, -1)
    out = _final_mlp_ref(cat, *params["final"])
    return out.reshape(B, N, -1)


# ----------------------------------------------------------------------------
# Synthetic parameters (BN folded to scale/shift, eval mode) + Pallas param prep
# ----------------------------------------------------------------------------
def _init_w(key, cin, cout):
    return jax.random.normal(key, (cin, cout), jnp.float32) / jnp.sqrt(float(cin))


def _fold_bn(key, channels, bias=None, eps=1e-5):
    kg, kb, km, kv = jax.random.split(key, 4)
    gamma = 1.0 + 0.1 * jax.random.normal(kg, (channels,), jnp.float32)
    beta = 0.1 * jax.random.normal(kb, (channels,), jnp.float32)
    mean = 0.1 * jax.random.normal(km, (channels,), jnp.float32)
    var = jax.random.uniform(kv, (channels,), jnp.float32, minval=0.5, maxval=1.5)
    scale = gamma / jnp.sqrt(var + eps)
    b = jnp.zeros((channels,), jnp.float32) if bias is None else bias
    shift = (b - mean) * scale + beta
    return scale.reshape(1, -1), shift.reshape(1, -1)


def init_dgcnn_params(key, emb_dims, in_channels, output_channels):
    keys = jax.random.split(key, 8)

    def edge(kk, cin, hidden, cout):
        k1, k2, k3, k4 = jax.random.split(kk, 4)
        w1 = _init_w(k1, 2 * cin, hidden)
        s1, t1 = _fold_bn(k2, hidden)
        w2 = _init_w(k3, hidden, cout)
        s2, t2 = _fold_bn(k4, cout)
        return (w1, s1, t1, w2, s2, t2)

    conv1 = edge(keys[0], in_channels, 64, 64)
    conv2 = edge(keys[1], 64, 64, 128)
    conv3 = edge(keys[2], 128, 128, emb_dims)

    cat_dim = 64 + 128 + emb_dims

    def point(kk, cin, cout):
        k1, k2, k3 = jax.random.split(kk, 3)
        w = _init_w(k1, cin, cout)
        b = 0.1 * jax.random.normal(k2, (cout,), jnp.float32)
        s, t = _fold_bn(k3, cout, bias=b)
        return w, s, t

    fw1, fs1, ft1 = point(keys[3], cat_dim, 512)
    fw2, fs2, ft2 = point(keys[4], 512, 256)
    k1, k2 = jax.random.split(keys[5], 2)
    fw3 = _init_w(k1, 256, output_channels)
    fb3 = (0.1 * jax.random.normal(k2, (output_channels,), jnp.float32)).reshape(1, -1)
    final = (fw1, fs1, ft1, fw2, fs2, ft2, fw3, fb3)

    return {"conv1": conv1, "conv2": conv2, "conv3": conv3, "final": final}


def _prep_edge(p, cin_true, cin_padded):
    """Fold BN scale into columns, decompose W1, pad hidden/cout to 128-lane density."""
    w1, s1, t1, w2, s2, t2 = p
    hidden = w1.shape[1]
    hp = _round_up(hidden, 128)
    cout = w2.shape[1]
    coutp = _round_up(cout, 128)
    w1 = w1 * s1
    w1_top = w1[:cin_true]                       # multiplies the gathered neighbor x_j
    w1_dif = w1[cin_true:] - w1[:cin_true]       # multiplies the center point x_i

    def pad_blk(w):
        return jnp.pad(w, ((0, cin_padded - cin_true), (0, hp - hidden)))

    w_uv = jnp.concatenate([pad_blk(w1_top), pad_blk(w1_dif)], axis=1)
    t_uv = jnp.concatenate([jnp.zeros((1, hp), jnp.float32), _pad_cols(t1, hp)], axis=1)
    w2p = jnp.pad(w2 * s2, ((0, hp - hidden), (0, coutp - cout)))
    return dict(
        w_uv=w_uv.astype(jnp.bfloat16),
        t_uv=t_uv.astype(jnp.float32),
        w2=w2p.astype(jnp.bfloat16),
        t2=_pad_cols(t2, coutp).astype(jnp.float32),
        hp=hp,
    ), cout, coutp


def _prep_head(p, widths_true, widths_padded):
    w1, s1, t1, w2, s2, t2, w3, b3 = p
    w1 = w1 * s1
    c1, c2, c3 = widths_true
    p1, p2, p3 = widths_padded
    w1a = jnp.pad(w1[:c1], ((0, p1 - c1), (0, 0)))
    w1b = jnp.pad(w1[c1:c1 + c2], ((0, p2 - c2), (0, 0)))
    w1c = jnp.pad(w1[c1 + c2:c1 + c2 + c3], ((0, p3 - c3), (0, 0)))
    coutp = _round_up(w3.shape[1], 128)
    return dict(
        w1a=w1a.astype(jnp.bfloat16), w1b=w1b.astype(jnp.bfloat16),
        w1c=w1c.astype(jnp.bfloat16), t1=t1.astype(jnp.float32),
        w2=(w2 * s2).astype(jnp.bfloat16), t2=t2.astype(jnp.float32),
        w3=_pad_cols(w3, coutp).astype(jnp.bfloat16),
        b3=_pad_cols(b3, coutp).astype(jnp.float32),
    )


def prepare_pallas_params(params, in_channels, output_channels):
    pp = {"out_channels": output_channels, "cfg": _chip_config()}
    widths_true, widths_padded = [], []
    prev_true = prev_pad = in_channels
    for name in ("conv1", "conv2", "conv3"):
        blk, cout, coutp = _prep_edge(params[name], prev_true, prev_pad)
        pp[name] = blk
        widths_true.append(cout)
        widths_padded.append(coutp)
        prev_true, prev_pad = cout, coutp
    pp["head"] = _prep_head(params["final"], tuple(widths_true), tuple(widths_padded))
    return pp


# ----------------------------------------------------------------------------
if __name__ == "__main__":
    B, N = 2, 64          # batch, number of points
    K_NN = 16             # k nearest neighbors (module default 32, scaled down)
    EMB = 128             # emb_dims (module default 512, scaled down)
    IN_C = 3
    OUT_C = 12

    key = jax.random.PRNGKey(0)
    kx, kp, kw = jax.random.split(key, 3)
    x = jax.random.normal(kx, (B, N, IN_C), jnp.float32)
    pos = jax.random.normal(kp, (B, N, IN_C), jnp.float32)
    params = init_dgcnn_params(kw, EMB, IN_C, OUT_C)
    pparams = prepare_pallas_params(params, IN_C, OUT_C)

    out = dgcnn_forward_pallas(pparams, x, pos, K_NN)
    out = jax.block_until_ready(out)
    assert out.shape == (B, N, OUT_C)

    ref = jax.block_until_ready(dgcnn_forward_ref(params, x, pos, K_NN))
    err = float(jnp.max(jnp.abs(out.astype(jnp.float32) - ref)) /
                (jnp.max(jnp.abs(ref)) + 1e-6))
    assert err < 5e-2, f"mismatch vs f32 reference, rel err {err}"

    print("KERNEL_OK")
</pallas_src>

<mosaic_0001>
module attributes {stable_mosaic.version = 11 : i64} {
  func.func @_uv_kernel(%arg0: i32, %arg1: memref<64x3xbf16, #tpu.memory_space<vmem>>, %arg2: memref<3x256xbf16, #tpu.memory_space<vmem>>, %arg3: memref<1x256xf32, #tpu.memory_space<vmem>>, %arg4: memref<64x128xf32, #tpu.memory_space<vmem>>, %arg5: memref<64x128xf32, #tpu.memory_space<vmem>>) attributes {dimension_semantics = [#tpu.dimension_semantics<parallel>], iteration_bounds = array<i64: 2>, scalar_prefetch = 0 : i64, scratch_operands = 0 : i64, tpu.core_type = #tpu.core_type<tc>, window_params = [{transform_indices = @transform_0, window_bounds = array<i64: 64, 3>}, {pipeline_mode = #tpu.pipeline_mode<synchronous>, transform_indices = @transform_1, window_bounds = array<i64: 3, 256>}, {pipeline_mode = #tpu.pipeline_mode<synchronous>, transform_indices = @transform_2, window_bounds = array<i64: 1, 256>}, {transform_indices = @transform_3, window_bounds = array<i64: 64, 128>}, {transform_indices = @transform_4, window_bounds = array<i64: 64, 128>}]} {
    %c0 = arith.constant 0 : index
    %c0_0 = arith.constant 0 : index
    %0 = vector.load %arg1[%c0, %c0_0] : memref<64x3xbf16, #tpu.memory_space<vmem>>, vector<64x3xbf16>
    %c0_1 = arith.constant 0 : index
    %c0_2 = arith.constant 0 : index
    %1 = vector.load %arg2[%c0_1, %c0_2] : memref<3x256xbf16, #tpu.memory_space<vmem>>, vector<3x256xbf16>
    %cst = arith.constant dense<0.000000e+00> : vector<64x256xf32>
    %2 = tpu.matmul %0, %1, %cst {dimension_numbers = #tpu.dot_dimension_numbers<[1], [0], [0], [1], [0, 0, 1, 1], [], []>} : vector<64x3xbf16>, vector<3x256xbf16>, vector<64x256xf32> -> vector<64x256xf32>
    %c0_3 = arith.constant 0 : index
    %c0_4 = arith.constant 0 : index
    %3 = vector.load %arg3[%c0_3, %c0_4] : memref<1x256xf32, #tpu.memory_space<vmem>>, vector<1x256xf32>
    %4 = vector.broadcast %3 : vector<1x256xf32> to vector<64x256xf32>
    %5 = arith.addf %2, %4 : vector<64x256xf32>
    %6 = vector.extract_strided_slice %5 {offsets = [0, 0], sizes = [64, 128], strides = [1, 1]} : vector<64x256xf32> to vector<64x128xf32>
    %c0_5 = arith.constant 0 : index
    %c0_6 = arith.constant 0 : index
    %7 = vector.load %arg4[%c0_5, %c0_6] : memref<64x128xf32, #tpu.memory_space<vmem>>, vector<64x128xf32>
    tpu.vector_store %arg4[%c0_5, %c0_6], %6 {strides = array<i32>} : memref<64x128xf32, #tpu.memory_space<vmem>>, vector<64x128xf32>,
    %8 = vector.extract_strided_slice %5 {offsets = [0, 128], sizes = [64, 128], strides = [1, 1]} : vector<64x256xf32> to vector<64x128xf32>
    %c0_7 = arith.constant 0 : index
    %c0_8 = arith.constant 0 : index
    %9 = vector.load %arg5[%c0_7, %c0_8] : memref<64x128xf32, #tpu.memory_space<vmem>>, vector<64x128xf32>
    tpu.vector_store %arg5[%c0_7, %c0_8], %8 {strides = array<i32>} : memref<64x128xf32, #tpu.memory_space<vmem>>, vector<64x128xf32>,
    return
  }
  func.func @transform_0(%arg0: i32) -> (i32, i32) {
    %c0_i32 = arith.constant 0 : i32
    %c0_i32_0 = arith.constant 0 : i32
    return %arg0, %c0_i32 : i32, i32
  }
  func.func @transform_1(%arg0: i32) -> (i32, i32) {
    %c0_i32 = arith.constant 0 : i32
    %c0_i32_0 = arith.constant 0 : i32
    %c0_i32_1 = arith.constant 0 : i32
    return %c0_i32, %c0_i32_0 : i32, i32
  }
  func.func @transform_2(%arg0: i32) -> (i32, i32) {
    %c0_i32 = arith.constant 0 : i32
    %c0_i32_0 = arith.constant 0 : i32
    %c0_i32_1 = arith.constant 0 : i32
    return %c0_i32, %c0_i32_0 : i32, i32
  }
  func.func @transform_3(%arg0: i32) -> (i32, i32) {
    %c0_i32 = arith.constant 0 : i32
    %c0_i32_0 = arith.constant 0 : i32
    return %arg0, %c0_i32 : i32, i32
  }
  func.func @transform_4(%arg0: i32) -> (i32, i32) {
    %c0_i32 = arith.constant 0 : i32
    %c0_i32_0 = arith.constant 0 : i32
    return %arg0, %c0_i32 : i32, i32
  }
}

</mosaic_0001>

<bundles_post_ra>
// kernel: tpu_custom_call.1
= control target key start
LH: loop header
LB: loop body
LE: loop exit
PB: predicated region body
PF: predicated region fallthrough
CT: control target
= control target key end

     0   :  { %10 = vsyncpa [#allocation3], 0  ;;  %s881_s0 = inlined_call_operand.vmem [shape: bf16[128,3], index: 0, kind: input, shape index: {}]   ;;  %s882_s1 = inlined_call_operand.vmem [shape: bf16[3,256], index: 1, kind: input, shape index: {}]   ;;  %s883_s2 = inlined_call_operand.vmem [shape: f32[1,256], index: 2, kind: input, shape index: {}]   ;;  %s884_s3 = inlined_call_operand.hbm [shape: f32[128,128], index: 3, kind: output, shape index: {0}]   ;;  %s885_s4 = inlined_call_operand.hbm [shape: f32[128,128], index: 4, kind: output, shape index: {1}]  }
   0x1   :  { %12 = vsyncpa [#allocation3 + $0x1], 0 }
   0x2   :  { %13 = vsyncpa [#allocation5], 0 }
   0x3   :  { %15 = vsyncpa [#allocation5 + $0x1], 0  ;;  %s711_s15 = smov 0   ;;  %s713_s16 = smov 0  }
   0x4   :  { %s715_s17 = smov 0   ;;  %s717_s18 = smov 0  }
   0x5 LB: > { %s732_s19 = sadd.s32 4294967295, %s678_s18   ;;  %s503_s20 = sadd.s32 4294967294, %s678_s18   ;;  %s678_s18 = sphi %s717_s18, %s891_s18   ;;  %s674_s17 = sphi %s715_s17, %s890_s17   ;;  %s670_s16 = sphi %s713_s16, %s889_s16   ;;  %s666_s15 = sphi %s711_s15, %s888_s15  }
   0x6   : > { %s736_s21 = sadd.s32 1, %s678_s18   ;;  %s96_s22 = sadd.s32 1, %s674_s17 }
   0x7   : > { %s93_s23 = ssub.s32 %s678_s18, %s736_s21  ;;  %p106_p0 = scmp.ne.s32.totalorder %s674_s17, %s670_s16 }
   0x8   : > { %p94_p1 = scmp.eq.s32.totalorder %s93_s23, 0  ;;  %p107_p2 = scmp.eq.s32.totalorder %s732_s19, 1 }
   0x9   : > { %p112_p3 = scmp.ne.s32.totalorder %s670_s16, %s666_s15  ;;  %p113_p4 = scmp.eq.s32.totalorder %s503_s20, 1 }
   0xa   : > { %s747_s24 = scalar_select %p94_p1, %s674_s17, %s96_s22  }
   0xb   : > { %p749_p5 = por %p107_p2, %p106_p0  ;;  %p753_p6 = por %p113_p4, %p112_p3 }
   0xc   : > { %p506_p7 = scmp.ge.s32.totalorder %s678_s18, 1  ;;  %p172_p8 = scmp.lt.s32.totalorder %s678_s18, 3 }
   0xe   : > { %p173_p9 = pnand %p506_p7, %p172_p8 }
   0xf   : > { %v515_v0 = vld.sshfl [vmem:[%s882_s1] sm:$0x33 pattern:$0x76325410] (!%p173_p9)  ;;  %vm275_vm0 = vcmask (!%p173_p9), 1040384   ;;  %vm276_vm1 = vcmask (!%p173_p9), 1041408   ;;  %v223_v12 = vlaneseq (!%p173_p9) }
  0x10   : > { %176 = sbr.rel (%p173_p9) target bundleno = 290 (0x122), region = 32  ;;  %v261_v1 = vcombine.high (!%p173_p9), %v515_v0, %v515_v0  ;;  %s509_s29 = sshll.u32 (!%p173_p9), %s732_s19, 3  ;;  %v680_v2 = vmov (!%p173_p9), 65535   ;;  %v681_v4 = vmov (!%p173_p9), 0   ;;  %vm262_vm2 = vcmask (!%p173_p9), 23552  }
  0x11   : > { %v277_v3 = vsel (!%p173_p9), %vm275_vm0, 4294967295, %v680_v2  ;;  %317 = vmatprep.mubr.bf16.mxu0 (!%p173_p9), %v681_v4  ;;  %337 = vmatprep.mubr.bf16.mxu1 (!%p173_p9), %v681_v4  ;;  %p204_p10 = scmp.lt.s32.totalorder (!%p173_p9), %s509_s29, 15  ;;  %v224_v13 = vshrl.u32 (!%p173_p9), %v223_v12, 7  ;;  %s767_s8 = sand.u32 (!%p173_p9), 1, %s670_s16   ;;  %v221_v15 = vld [vmem:[%s883_s2] sm:$0x3] (!%p173_p9) }
  0x12   : > { %v278_v5 = vsel (!%p173_p9), %vm276_vm1, %v277_v3, 0  ;;  %s507_s11 = sshll.u32 (!%p173_p9), %s767_s8, 6  ;;  %s528_s14 = sshll.u32 (!%p173_p9), %s732_s19, 10 }
  0x13   : > { %v283_v6 = vand.u32 (!%p173_p9), %v278_v5, %v261_v1  ;;  %v280_v7 = vand.u32 (!%p173_p9), %v515_v0, %v278_v5  ;;  %v225_v14 = vsub.s32 (!%p173_p9), 0, %v224_v13  ;;  %v229_v16 = vsub.s32 (!%p173_p9), 1, %v224_v13  ;;  %s773_s12 = scalar_lea.vmem (!%p173_p9), [#allocation2], %s507_s11  ;;  %s777_s13 = scalar_lea.vmem (!%p173_p9), [#allocation4], %s507_s11 }
  0x14   : > { %s393_s20 = sshll.u32 (!%p173_p9), %s773_s12, 4  ;;  %s409_s22 = sshll.u32 (!%p173_p9), %s777_s13, 4  ;;  %s794_s20 = int_to_ptr.vmem [resolvable:$true] %s393_s20  ;;  %s805_s22 = int_to_ptr.vmem [resolvable:$true] %s409_s22 }
  0x15   : > { %285 = vmatprep.subr.bf16.mxu0 (!%p173_p9), %v283_v6  ;;  %530 = vmatprep.subr.bf16.mxu1 (!%p173_p9), %v283_v6  ;;  %v226_v17 = vrot.slane (!%p173_p9), %v221_v15, %v225_v14  ;;  %v230_v18 = vrot.slane (!%p173_p9), %v221_v15, %v229_v16  ;;  %s792_s27 = scalar_lea.hbm (!%p173_p9), %s884_s3, %s528_s14  ;;  %s375_s5 = scalar_lea.sflag (!%p173_p9), [#allocation3], %s767_s8 }
  0x16   : > { %286 = vmatpush1.bf16.msra.mxu0 (!%p173_p9), %v280_v7  ;;  %531 = vmatpush1.bf16.msra.mxu1 (!%p173_p9), %v280_v7  ;;  %s584_s6 = scalar_lea.vmem (!%p173_p9), %s794_s20, 1024 }
  0x17   : > { %s893_s29 = smov (!%p204_p10, %s509_s29), 15  ;;  %p585_p11 = scmp.ne.s32.totalorder %s794_s20, %s584_s6 }
  0x18   : > { %s510_s30 = sshll.u32 %s893_s29, 2 }
  0x19   : > { %s207_s7 = scalar_lea.vmem %s881_s0, %s510_s30  ;;  %s803_s30 = scalar_lea.hbm %s885_s4, %s528_s14 }
  0x1a   : > { %v580_v8 = vld [vmem:[%s207_s7] sm:$0xff]   ;;  %v581_v9 = vld [vmem:[%s207_s7 + $0x10] sm:$0xff]   ;;  %v582_v10 = vld [vmem:[%s207_s7 + $0x8] sm:$0xff]   ;;  %p586_p12 = pnand %p585_p11, %p749_p5 }
  0x1b   : > { %516 = vmatmul.mubr.msk.bf16.vlgmr.msra.gmra.mrb[0].mxu0 %vm262_vm2, %v580_v8  ;;  %518 = vmatmul.mubr.msk.bf16.vlgmr.msra.gmra.mrb[0].mxu1 %vm262_vm2, %v581_v9  ;;  %v583_v11 = vld [vmem:[%s207_s7 + $0x18] sm:$0xff]   ;;  %s682_s7 = smov [#allocation2]  }
  0x1c   : > { %327 = vmatprep.mubr.bf16.mxu0 %v681_v4  ;;  %347 = vmatprep.mubr.bf16.mxu1 %v681_v4  ;;  %p587_p13 = pneg %p586_p12  ;;  %s588_s9 = sshll.u32 %s682_s7, 4  ;;  %s589_s9 = int_to_ptr.vmem [resolvable:$false] %s588_s9 }
  0x1d   : > { %s590_s10 = scalar_lea.vmem %s589_s9, 2048  ;;  %p591_p0 = scmp.lt.s32.totalorder %s794_s20, %s589_s9 }
  0x1e   : > { %p592_p1 = scmp.lt.s32.totalorder %s590_s10, %s584_s6 }
  0x20   : > { %p593_p2 = por %p592_p1, %p591_p0 }
  0x22   : > { %p594_p3 = pnand %p593_p2, %p587_p13 }
  0x23   : > { %517 = vmatmul.mubr.msk.bf16.gmra.mrb[4].mxu0 %vm262_vm2, %v582_v10  ;;  %519 = vmatmul.mubr.msk.bf16.gmra.mrb[4].mxu1 %vm262_vm2, %v583_v11 }
  0xee   : > { %v319_v19 = vpop.f32.mrb[0].mxu0  ;;  %v339_v21 = vpop.f32.mrb[0].mxu1 }
  0xef   : > { %v320_v20 = vadd.f32 %v319_v19, %v226_v17  ;;  %v321_v22 = vpop.f32.mrb[1].mxu0  ;;  %v340_v23 = vadd.f32 %v339_v21, %v226_v17  ;;  %v341_v25 = vpop.f32.mrb[1].mxu1 }
  0xf0   : > { %v322_v24 = vadd.f32 %v321_v22, %v230_v18  ;;  %v323_v26 = vpop.f32.mrb[2].mxu0  ;;  %v342_v27 = vadd.f32 %v341_v25, %v230_v18  ;;  %v343_v29 = vpop.f32.mrb[2].mxu1 }
  0xf1   : > { %358 = vst [vmem:[%s773_s12] sm:$0xff] %v320_v20  ;;  %v324_v28 = vadd.f32 %v323_v26, %v226_v17  ;;  %v325_v30 = vpop.f32.mrb[3].mxu0  ;;  %362 = vst [vmem:[%s773_s12 + $0x20] sm:$0xff] %v340_v23  ;;  %v344_v31 = vadd.f32 %v343_v29, %v226_v17  ;;  %v345_v33 = vpop.f32.mrb[3].mxu1 }
  0xf2   : > { %366 = vst [vmem:[%s777_s13] sm:$0xff] %v322_v24  ;;  %v326_v32 = vadd.f32 %v325_v30, %v230_v18  ;;  %370 = vst [vmem:[%s777_s13 + $0x20] sm:$0xff] %v342_v27  ;;  %v346_v34 = vadd.f32 %v345_v33, %v230_v18 }
  0xf3   : > { %359 = vst [vmem:[%s773_s12 + $0x8] sm:$0xff] %v324_v28  ;;  %363 = vst [vmem:[%s773_s12 + $0x28] sm:$0xff] %v344_v31 }
  0xf4   : > { %367 = vst [vmem:[%s777_s13 + $0x8] sm:$0xff] %v326_v32  ;;  %371 = vst [vmem:[%s777_s13 + $0x28] sm:$0xff] %v346_v34 }
  0xf6   : > { %v329_v35 = vpop.f32.mrb[4].mxu0  ;;  %v349_v37 = vpop.f32.mrb[4].mxu1 }
  0xf7   : > { %v330_v36 = vadd.f32 %v329_v35, %v226_v17  ;;  %v331_v38 = vpop.f32.mrb[5].mxu0  ;;  %v350_v39 = vadd.f32 %v349_v37, %v226_v17  ;;  %v351_v41 = vpop.f32.mrb[5].mxu1 }
  0xf8   : > { %v332_v40 = vadd.f32 %v331_v38, %v230_v18  ;;  %v333_v42 = vpop.f32.mrb[6].mxu0  ;;  %v352_v43 = vadd.f32 %v351_v41, %v230_v18  ;;  %v353_v45 = vpop.f32.mrb[6].mxu1 }
  0xf9   : > { %360 = vst [vmem:[%s773_s12 + $0x10] sm:$0xff] %v330_v36  ;;  %v334_v44 = vadd.f32 %v333_v42, %v226_v17  ;;  %v335_v46 = vpop.f32.mrb[7].mxu0  ;;  %364 = vst [vmem:[%s773_s12 + $0x30] sm:$0xff] %v350_v39  ;;  %v354_v47 = vadd.f32 %v353_v45, %v226_v17  ;;  %v355_v49 = vpop.f32.mrb[7].mxu1 }
  0xfa   : > { %368 = vst [vmem:[%s777_s13 + $0x10] sm:$0xff] %v332_v40  ;;  %v336_v48 = vadd.f32 %v335_v46, %v230_v18  ;;  %372 = vst [vmem:[%s777_s13 + $0x30] sm:$0xff] %v352_v43  ;;  %v356_v50 = vadd.f32 %v355_v49, %v230_v18 }
  0xfb   : > { %361 = vst [vmem:[%s773_s12 + $0x18] sm:$0xff] %v334_v44  ;;  %365 = vst [vmem:[%s773_s12 + $0x38] sm:$0xff] %v354_v47 }
  0xfc   : > { %369 = vst [vmem:[%s777_s13 + $0x18] sm:$0xff] %v336_v48  ;;  %373 = vst [vmem:[%s777_s13 + $0x38] sm:$0xff] %v356_v50 }
  0xfd   : > { %597 = shalt.err (!%p594_p3)
}
  0xfe   : > { %s598_s11 = scalar_lea.hbm %s792_s27, 1024  ;;  %s602_s14 = scalar_lea.hbm %s884_s3, 2048 }
  0xff   : > { %p599_p4 = scmp.ne.s32.totalorder %s792_s27, %s598_s11  ;;  %p603_p9 = scmp.lt.u32.totalorder %s792_s27, %s884_s3 }
 0x100   : > { %p604_p10 = scmp.lt.u32.totalorder %s602_s14, %s598_s11  ;;  %p606_p12 = scmp.lt.u32.totalorder %s598_s11, %s792_s27 }
 0x101   : > { %p600_p7 = pnand %p599_p4, %p749_p5 }
 0x102   : > { %p605_p11 = por %p604_p10, %p603_p9 }
 0x103   : > { %p601_p8 = pneg %p600_p7 }
 0x104   : > { %p607_p13 = por %p606_p12, %p605_p11 }
 0x106   : > { %p608_p0 = pnand %p607_p13, %p601_p8 }
 0x108   : > { %611 = shalt.err (!%p608_p0)
}
 0x109   : > { %s683_s28 = smov 128   ;;  %s684_s29 = smov 8  }
 0x10a   : > { %532 = dma.vmem_to_hbm [thread:$0]  (%p749_p5), %s794_s20, 1024, %s792_s27, %s375_s5, %s683_s28, %s683_s28, %s684_s29  }
 0x10b   : > { %s380_s6 = scalar_lea.sflag [#allocation5], %s767_s8  ;;  %s612_s7 = scalar_lea.vmem %s805_s22, 1024 }
 0x10c   : > { %p613_p1 = scmp.ne.s32.totalorder %s805_s22, %s612_s7  ;;  %s685_s9 = smov [#allocation4]  }
 0x10d   : > { %s616_s10 = sshll.u32 %s685_s9, 4  ;;  %s617_s10 = int_to_ptr.vmem [resolvable:$false] %s616_s10 }
 0x10e   : > { %p614_p2 = pnand %p613_p1, %p749_p5  ;;  %s618_s11 = scalar_lea.vmem %s617_s10, 2048 }
 0x10f   : > { %p619_p4 = scmp.lt.s32.totalorder %s805_s22, %s617_s10  ;;  %p620_p7 = scmp.lt.s32.totalorder %s618_s11, %s612_s7 }
 0x110   : > { %p615_p3 = pneg %p614_p2 }
 0x111   : > { %p621_p8 = por %p620_p7, %p619_p4 }
 0x113   : > { %p622_p9 = pnand %p621_p8, %p615_p3 }
 0x115   : > { %625 = shalt.err (!%p622_p9)
}
 0x116   : > { %s626_s20 = scalar_lea.hbm %s803_s30, 1024  ;;  %s630_s12 = scalar_lea.hbm %s885_s4, 2048 }
 0x117   : > { %p627_p10 = scmp.ne.s32.totalorder %s803_s30, %s626_s20  ;;  %p631_p13 = scmp.lt.u32.totalorder %s803_s30, %s885_s4 }
 0x118   : > { %p632_p0 = scmp.lt.u32.totalorder %s630_s12, %s626_s20  ;;  %p634_p2 = scmp.lt.u32.totalorder %s626_s20, %s803_s30 }
 0x119   : > { %p628_p11 = pnand %p627_p10, %p749_p5 }
 0x11a   : > { %p633_p1 = por %p632_p0, %p631_p13 }
 0x11b   : > { %p629_p12 = pneg %p628_p11 }
 0x11c   : > { %p635_p3 = por %p634_p2, %p633_p1 }
 0x11e   : > { %p636_p4 = pnand %p635_p3, %p629_p12 }
 0x120   : > { %639 = shalt.err (!%p636_p4)
}
 0x121   : > { %533 = dma.vmem_to_hbm [thread:$0]  (%p749_p5), %s805_s22, 1024, %s803_s30, %s380_s6, %s683_s28, %s683_s28, %s684_s29  }
 0x122 PF: > { %p543_p7 = scmp.ge.s32.totalorder %s678_s18, 2  ;;  %s424_s19 = sand.u32 1, %s666_s15  }
 0x123   : > { %s425_s23 = scalar_lea.sflag [#allocation3], %s424_s19 }
 0x124   : > { %p537_p8 = pnand %p543_p7, %p753_p6 }
 0x126   : > { %657 = dma.done.wait (!%p537_p8), %s425_s23, 1024  }
 0x127   : > { %659 = vsyncadd (!%p537_p8), %s425_s23, 4294966272  ;;  %s434_s25 = scalar_lea.sflag [#allocation5], %s424_s19 }
 0x128   : > { %661 = dma.done.wait (!%p537_p8), %s434_s25, 1024  }
 0x129   : > { %663 = vsyncadd (!%p537_p8), %s434_s25, 4294966272  ;;  %p18_p5 = scmp.ge.s32.totalorder %s736_s21, 4   ;;  %s888_s15 = smov %s670_s16 }
 0x12a   : > { %s889_s16 = smov %s674_s17  ;;  %s890_s17 = smov %s747_s24 }
 0x12b   : > { %s891_s18 = smov %s736_s21  ;;  %20 = sbr.rel (!%p18_p5) target bundleno = 5 (0x5), region = 84 }
 0x132   :  { %439 = vsyncpa [#allocation3], 1 }
 0x133   :  { %441 = vsyncpa [#allocation3 + $0x1], 1 }
 0x134   :  { %442 = vsyncpa [#allocation5], 1 }
 0x135   :  { %444 = vsyncpa [#allocation5 + $0x1], 1 }

</bundles_post_ra>
